<compile_context>
chip_gen: v6e
topology: v6e:2x2x1
jax: 0.10.0
libtpu: 0.0.40
codegen_flags: <defaults>
</compile_context>

<pallas_src>
import functools

import jax
import jax.numpy as jnp
from jax.experimental import pallas as pl
from jax.experimental.pallas import tpu as pltpu

_NEG_BIG = -1e30  # finite "-inf" for the running row-max (avoids inf arithmetic)


# ---------------------------------------------------------------------------
# In-kernel building blocks
# ---------------------------------------------------------------------------
def _init_scratch(m_sc, l_sc, s_sc):
    m_sc[...] = jnp.full_like(m_sc, _NEG_BIG)
    l_sc[...] = jnp.zeros_like(l_sc)
    s_sc[...] = jnp.zeros_like(s_sc)


def _online_softmax_step(adc, denom_keep, pos_contrib, col_valid, m_sc, l_sc, s_sc):
    """One column chunk of the online log-sum-exp / positive-sum recurrence.

    adc:         [TQ, TK] f32 raw logits (already include 1/temperature).
    denom_keep:  [TQ, TK] bool, valid column and not the self-similarity entry.
    pos_contrib: [TQ, TK] f32, positive-weighted logits (0 where not positive).
    col_valid:   [TQ, TK] bool, column is a real (non-padded) contrast column.
    """
    chunk_max = jnp.max(jnp.where(col_valid, adc, _NEG_BIG), axis=1, keepdims=True)
    m_prev = m_sc[...]
    m_new = jnp.maximum(m_prev, chunk_max)
    alpha = jnp.exp(m_prev - m_new)                      # rescale old denominator
    e = jnp.where(denom_keep, jnp.exp(adc - m_new), 0.0)
    l_sc[...] = alpha * l_sc[...] + jnp.sum(e, axis=1, keepdims=True)
    s_sc[...] = s_sc[...] + jnp.sum(pos_contrib, axis=1, keepdims=True)
    m_sc[...] = m_new


def _finalize(out_ref, inv_cnt_ref, m_sc, l_sc, s_sc, scale):
    # mean_log_prob_pos = sum(pos*adc)/cnt - (row_max + log(sum_exp + 1e-6))
    # Anchors with zero positives (inv_cnt == 0) get loss 0 (PyTorch: NaN).
    inv_cnt = inv_cnt_ref[...]
    log_denom = m_sc[...] + jnp.log(l_sc[...] + 1e-6)
    mean_log_prob_pos = s_sc[...] * inv_cnt - jnp.where(inv_cnt != 0.0, log_denom, 0.0)
    out_ref[...] = (-scale) * mean_log_prob_pos


def _supcon_label_kernel(lab_row_ref, lab_col_ref, inv_cnt_ref, q_ref, k_ref,
                         out_ref, m_sc, l_sc, s_sc, *,
                         inv_temperature, scale, tile_rows, tile_cols, n_valid):
    # lab_row_ref: [TQ, 1] i32, lab_col_ref: [1, TK] i32, inv_cnt_ref: [TQ, 1] f32
    # q_ref: [TQ, D] (bf16/f32), k_ref: [TK, D], out_ref: [TQ, 1] f32
    i = pl.program_id(0)
    k = pl.program_id(1)

    @pl.when(k == 0)
    def _():
        _init_scratch(m_sc, l_sc, s_sc)

    # Fold 1/temperature into the small [TQ, D] anchor tile (not [TQ, TK]).
    q = q_ref[...] * inv_temperature
    adc = jax.lax.dot_general(q, k_ref[...], (((1,), (1,)), ((), ())),
                              preferred_element_type=jnp.float32)     # [TQ, TK]

    row_ids = jax.lax.broadcasted_iota(jnp.int32, (tile_rows, tile_cols), 0) + i * tile_rows
    col_ids = jax.lax.broadcasted_iota(jnp.int32, (tile_rows, tile_cols), 1) + k * tile_cols
    col_valid = col_ids < n_valid                  # drop zero-padded contrast cols
    not_self = row_ids != col_ids                  # drop self-similarity diagonal
    denom_keep = jnp.logical_and(col_valid, not_self)
    positive = jnp.logical_and(denom_keep, lab_row_ref[...] == lab_col_ref[...])
    pos_contrib = jnp.where(positive, adc, 0.0)    # no f32 mask materialization

    _online_softmax_step(adc, denom_keep, pos_contrib, col_valid, m_sc, l_sc, s_sc)

    @pl.when(k == pl.num_programs(1) - 1)
    def _():
        _finalize(out_ref, inv_cnt_ref, m_sc, l_sc, s_sc, scale)


def _supcon_mask_kernel(w_ref, inv_cnt_ref, q_ref, k_ref,
                        out_ref, m_sc, l_sc, s_sc, *,
                        inv_temperature, scale, tile_rows, tile_cols, n_valid):
    # Fallback for arbitrary (possibly weighted / asymmetric) user masks.
    # w_ref: [TQ, TK] f32 positive weights (f32 kept for exactness).
    i = pl.program_id(0)
    k = pl.program_id(1)

    @pl.when(k == 0)
    def _():
        _init_scratch(m_sc, l_sc, s_sc)

    q = q_ref[...] * inv_temperature
    adc = jax.lax.dot_general(q, k_ref[...], (((1,), (1,)), ((), ())),
                              preferred_element_type=jnp.float32)

    row_ids = jax.lax.broadcasted_iota(jnp.int32, (tile_rows, tile_cols), 0) + i * tile_rows
    col_ids = jax.lax.broadcasted_iota(jnp.int32, (tile_rows, tile_cols), 1) + k * tile_cols
    col_valid = col_ids < n_valid
    not_self = row_ids != col_ids
    denom_keep = jnp.logical_and(col_valid, not_self)
    w = jnp.where(not_self, w_ref[...], 0.0)       # padded cols already zero in w
    pos_contrib = w * adc

    _online_softmax_step(adc, denom_keep, pos_contrib, col_valid, m_sc, l_sc, s_sc)

    @pl.when(k == pl.num_programs(1) - 1)
    def _():
        _finalize(out_ref, inv_cnt_ref, m_sc, l_sc, s_sc, scale)


# ---------------------------------------------------------------------------
# Wrapper helpers
# ---------------------------------------------------------------------------
def _vmem_capacity_bytes():
    try:
        return int(pltpu.get_tpu_info().vmem_capacity_bytes)
    except Exception:
        return 64 * 1024 * 1024   # conservative fallback (v7x per-TensorCore VMEM)


def _choose_tiles(m, n, d, feat_itemsize, vmem_limit, mask_streamed):
    """Pick (row_tile, col_tile) from a simple VMEM working-set model."""
    row_opts = (m,) if m <= 512 else (512, 256, 128)
    col_opts = (n,) if n <= 2048 else (2048, 1024, 512, 256, 128)
    budget = (vmem_limit * 6) // 10          # headroom for compiler temporaries
    for tq in row_opts:
        for tk in col_opts:
            live = 24 * tq * tk                          # ~6 live f32 [TQ,TK] temps
            live += 2 * (tq + tk) * d * feat_itemsize    # double-buffered feat tiles
            if mask_streamed:
                live += 2 * tq * tk * 4                  # double-buffered f32 weights
            if live <= budget:
                return tq, tk
    return row_opts[-1], col_opts[-1]


def _pad_rows(x, target_rows):
    pad = target_rows - x.shape[0]
    if pad == 0:
        return x
    return jnp.pad(x, ((0, pad),) + ((0, 0),) * (x.ndim - 1))


# ---------------------------------------------------------------------------
# Public entry point
# ---------------------------------------------------------------------------
def supcon_loss(features, labels=None, mask=None, *, temperature=0.07,
                contrast_mode="all", base_temperature=0.07,
                compute_dtype=jnp.bfloat16, row_tile=None, col_tile=None):
    """JAX/Pallas equivalent of SupConLoss.forward.

    compute_dtype: dtype the feature tiles are streamed/multiplied in (bf16 by
    default; pass jnp.float32 for bit-faithful accuracy).  row_tile/col_tile
    override the automatic tile choice (testing / tuning).
    """
    if features.ndim < 3:
        raise ValueError("`features` needs to be [bsz, n_views, ...]")
    if features.ndim > 3:
        features = features.reshape(features.shape[0], features.shape[1], -1)
    bsz, n_views, dim = features.shape
    if labels is not None and mask is not None:
        raise ValueError("Cannot define both `labels` and `mask`")

    contrast_count = n_views
    n_cols = bsz * contrast_count
    # torch.cat(torch.unbind(features, 1), 0): view-major stacking -> [N, D].
    contrast_feature = jnp.transpose(features, (1, 0, 2)).reshape(n_cols, dim)

    if contrast_mode == "one":
        anchor_count = 1
    elif contrast_mode == "all":
        anchor_count = contrast_count
    else:
        raise ValueError("Unknown mode: {}".format(contrast_mode))
    m_rows = bsz * anchor_count
    # In view-major order the anchors are always a prefix of the contrast slab.
    anchor_feature = contrast_feature[:m_rows]

    # Exact per-anchor positive counts (and reciprocals) precomputed in JAX:
    # O(bsz^2) bool work, removes an in-kernel [TQ,N] reduction entirely.
    base_labels = None
    if mask is None:
        if labels is None:
            base_labels = jnp.arange(bsz, dtype=jnp.int32)   # SimCLR: eye(bsz)
        else:
            base_labels = jnp.asarray(labels).reshape(-1).astype(jnp.int32)
            if base_labels.shape[0] != bsz:
                raise ValueError("Num of labels does not match num of features")
        counts_b = jnp.sum(base_labels[:, None] == base_labels[None, :],
                           axis=1).astype(jnp.float32)       # includes self
        cnt = jnp.tile(counts_b * contrast_count - 1.0, anchor_count)
    else:
        mask = jnp.asarray(mask, dtype=jnp.float32)
        if mask.shape != (bsz, bsz):
            raise ValueError("`mask` must have shape [bsz, bsz]")
        cnt_b = jnp.sum(mask, axis=1) * contrast_count - jnp.diagonal(mask)
        cnt = jnp.tile(cnt_b, anchor_count)
    inv_cnt = jnp.where(cnt != 0.0, 1.0 / cnt, 0.0).astype(jnp.float32)

    # Tile sizes / VMEM budget (per TPU generation).
    vmem_limit = (_vmem_capacity_bytes() * 3) // 4
    feat_itemsize = jnp.dtype(compute_dtype).itemsize
    tq, tk = _choose_tiles(m_rows, n_cols, dim, feat_itemsize, vmem_limit,
                           mask_streamed=(mask is not None))
    if row_tile is not None:
        tq = int(row_tile)
    if col_tile is not None:
        tk = int(col_tile)
    m_pad = -(-m_rows // tq) * tq
    n_pad = -(-n_cols // tk) * tk

    anchor_c = _pad_rows(anchor_feature.astype(compute_dtype), m_pad)
    contrast_c = _pad_rows(contrast_feature.astype(compute_dtype), n_pad)
    inv_cnt_col = _pad_rows(inv_cnt, m_pad).reshape(m_pad, 1)

    grid = (m_pad // tq, n_pad // tk)
    scale = float(temperature) / float(base_temperature)
    inv_t = 1.0 / float(temperature)

    feat_specs = [
        pl.BlockSpec((tq, dim), lambda i, k: (i, 0)),   # anchor tile (revisited over k)
        pl.BlockSpec((tk, dim), lambda i, k: (k, 0)),   # contrast column chunk
    ]
    invcnt_spec = pl.BlockSpec((tq, 1), lambda i, k: (i, 0))
    out_spec = pl.BlockSpec((tq, 1), lambda i, k: (i, 0))
    out_shape = jax.ShapeDtypeStruct((m_pad, 1), jnp.float32)
    scratch = [pltpu.VMEM((tq, 1), jnp.float32)] * 3    # running max / denom / pos-sum

    if mask is None:
        full_labels = jnp.tile(base_labels, contrast_count)                 # [N]
        lab_row = _pad_rows(full_labels[:m_rows], m_pad).reshape(m_pad, 1)  # [Mp, 1]
        lab_col = jnp.pad(full_labels, (0, n_pad - n_cols)).reshape(1, n_pad)
        kernel = functools.partial(_supcon_label_kernel, inv_temperature=inv_t,
                                   scale=scale, tile_rows=tq, tile_cols=tk,
                                   n_valid=n_cols)
        in_specs = [
            pl.BlockSpec((tq, 1), lambda i, k: (i, 0)),      # anchor-row labels
            pl.BlockSpec((1, tk), lambda i, k: (0, k)),      # contrast-col labels
            invcnt_spec,
        ] + feat_specs
        args = (lab_row, lab_col, inv_cnt_col, anchor_c, contrast_c)
    else:
        # Keep user masks in f32 (weighted / asymmetric masks stay exact).
        cols = jnp.tile(mask, (1, contrast_count))                           # [bsz, N]
        cols = jnp.pad(cols, ((0, 0), (0, n_pad - n_cols)))
        if bsz % tq == 0:
            # Row reuse across views: anchor row r reads user-mask row r % bsz.
            n_rep = bsz // tq
            w_arr = cols
            w_spec = pl.BlockSpec((tq, tk), lambda i, k: (i % n_rep, k))
        else:
            w_arr = jnp.pad(jnp.tile(cols, (anchor_count, 1)),
                            ((0, m_pad - m_rows), (0, 0)))
            w_spec = pl.BlockSpec((tq, tk), lambda i, k: (i, k))
        kernel = functools.partial(_supcon_mask_kernel, inv_temperature=inv_t,
                                   scale=scale, tile_rows=tq, tile_cols=tk,
                                   n_valid=n_cols)
        in_specs = [w_spec, invcnt_spec] + feat_specs
        args = (w_arr, inv_cnt_col, anchor_c, contrast_c)

    per_anchor = pl.pallas_call(
        kernel,
        out_shape=out_shape,
        grid_spec=pltpu.PrefetchScalarGridSpec(
            num_scalar_prefetch=0,
            grid=grid,
            in_specs=in_specs,
            out_specs=out_spec,
            scratch_shapes=scratch,
        ),
        compiler_params=pltpu.CompilerParams(
            dimension_semantics=("parallel", "arbitrary"),
            vmem_limit_bytes=int(vmem_limit),
        ),
    )(*args)

    # Mean over the real anchors only (== loss.view(anchor_count, bsz).mean()).
    return jnp.sum(per_anchor[:m_rows, 0]) / m_rows


# ---------------------------------------------------------------------------
# Pure-JAX reference mirroring the PyTorch module (for testing).
# ---------------------------------------------------------------------------
def _supcon_loss_ref(features, labels=None, mask=None, temperature=0.07,
                     contrast_mode="all", base_temperature=0.07):
    bsz, n_views, _ = features.shape
    if labels is None and mask is None:
        mask = jnp.eye(bsz, dtype=jnp.float32)
    elif labels is not None:
        labels = labels.reshape(-1, 1)
        mask = (labels == labels.T).astype(jnp.float32)
    else:
        mask = mask.astype(jnp.float32)
    contrast_count = n_views
    cf = jnp.concatenate([features[:, v] for v in range(n_views)], axis=0)
    if contrast_mode == "one":
        af = features[:, 0]
        anchor_count = 1
    else:
        af = cf
        anchor_count = contrast_count
    adc = jnp.dot(af, cf.T) / temperature
    logits = adc - jnp.max(adc, axis=1, keepdims=True)
    mask = jnp.tile(mask, (anchor_count, contrast_count))
    m = bsz * anchor_count
    n = bsz * contrast_count
    logits_mask = jnp.ones((m, n), jnp.float32).at[
        jnp.arange(m), jnp.arange(m)].set(0.0)
    mask = mask * logits_mask
    exp_logits = jnp.exp(logits) * logits_mask
    log_prob = logits - jnp.log(exp_logits.sum(1, keepdims=True) + 1e-6)
    mlpp = (mask * log_prob).sum(1) / mask.sum(1)
    return jnp.mean(-(temperature / base_temperature) * mlpp)


if __name__ == "__main__":
    key = jax.random.PRNGKey(0)
    bsz, n_views, feat_dim = 4, 2, 32
    feats = jax.random.normal(key, (bsz, n_views, feat_dim), dtype=jnp.float32)
    feats = feats / jnp.linalg.norm(feats, axis=-1, keepdims=True)
    labels = jnp.array([0, 1, 0, 1], dtype=jnp.int32)

    # bf16 feature streaming -> compare against the f32 reference at a few %.
    BF16_TOL = dict(rtol=3e-2, atol=3e-2)
    F32_TOL = dict(rtol=1e-3, atol=1e-3)

    # 1) SimCLR / unsupervised default ('all', no labels, no mask).
    loss = jax.block_until_ready(supcon_loss(feats))
    ref = _supcon_loss_ref(feats)
    assert jnp.allclose(loss, ref, **BF16_TOL), (loss, ref)

    # 2) Supervised path with labels ('all').
    loss_l = jax.block_until_ready(supcon_loss(feats, labels=labels))
    ref_l = _supcon_loss_ref(feats, labels=labels)
    assert jnp.allclose(loss_l, ref_l, **BF16_TOL), (loss_l, ref_l)

    # 3) 'one' contrast mode with labels.
    loss_o = jax.block_until_ready(
        supcon_loss(feats, labels=labels, contrast_mode="one"))
    ref_o = _supcon_loss_ref(feats, labels=labels, contrast_mode="one")
    assert jnp.allclose(loss_o, ref_o, **BF16_TOL), (loss_o, ref_o)

    # 4) Explicit user-supplied mask (f32 weights streamed).
    user_mask = (labels[:, None] == labels[None, :]).astype(jnp.float32)
    loss_m = jax.block_until_ready(supcon_loss(feats, mask=user_mask))
    ref_m = _supcon_loss_ref(feats, mask=user_mask)
    assert jnp.allclose(loss_m, ref_m, **BF16_TOL), (loss_m, ref_m)

    # 5) f32 compute path, multi-tile grid + row/col zero padding (exercises
    #    the online log-sum-exp over several column chunks) at tight tolerance.
    bsz2 = 130
    feats2 = jax.random.normal(jax.random.PRNGKey(1), (bsz2, 2, feat_dim),
                               dtype=jnp.float32)
    feats2 = feats2 / jnp.linalg.norm(feats2, axis=-1, keepdims=True)
    labels2 = (jnp.arange(bsz2) % 7).astype(jnp.int32)
    loss_t = jax.block_until_ready(
        supcon_loss(feats2, labels=labels2, compute_dtype=jnp.float32,
                    row_tile=128, col_tile=128))
    ref_t = _supcon_loss_ref(feats2, labels=labels2)
    assert jnp.allclose(loss_t, ref_t, **F32_TOL), (loss_t, ref_t)

    # 6) f32 mask path exercising the row-reuse (modulo) mask index_map.
    bsz3 = 256
    feats3 = jax.random.normal(jax.random.PRNGKey(2), (bsz3, 2, feat_dim),
                               dtype=jnp.float32)
    feats3 = feats3 / jnp.linalg.norm(feats3, axis=-1, keepdims=True)
    labels3 = (jnp.arange(bsz3) % 5).astype(jnp.int32)
    mask3 = (labels3[:, None] == labels3[None, :]).astype(jnp.float32)
    loss_mm = jax.block_until_ready(
        supcon_loss(feats3, mask=mask3, compute_dtype=jnp.float32,
                    row_tile=128, col_tile=256))
    ref_mm = _supcon_loss_ref(feats3, mask=mask3)
    assert jnp.allclose(loss_mm, ref_mm, **F32_TOL), (loss_mm, ref_mm)

    print("KERNEL_OK")
</pallas_src>

<mosaic_0001>
module attributes {stable_mosaic.version = 11 : i64} {
  func.func @_supcon_label_kernel(%arg0: i32, %arg1: i32, %arg2: memref<8x1xi32, #tpu.memory_space<vmem>>, %arg3: memref<1x8xi32, #tpu.memory_space<vmem>>, %arg4: memref<8x1xf32, #tpu.memory_space<vmem>>, %arg5: memref<8x32xbf16, #tpu.memory_space<vmem>>, %arg6: memref<8x32xbf16, #tpu.memory_space<vmem>>, %arg7: memref<8x1xf32, #tpu.memory_space<vmem>>, %arg8: memref<8x1xf32, #tpu.memory_space<vmem>>, %arg9: memref<8x1xf32, #tpu.memory_space<vmem>>, %arg10: memref<8x1xf32, #tpu.memory_space<vmem>>) attributes {dimension_semantics = [#tpu.dimension_semantics<parallel>, #tpu.dimension_semantics<arbitrary>], iteration_bounds = array<i64: 1, 1>, scalar_prefetch = 0 : i64, scratch_operands = 3 : i64, tpu.core_type = #tpu.core_type<tc>, window_params = [{transform_indices = @transform_0, window_bounds = array<i64: 8, 1>}, {transform_indices = @transform_1, window_bounds = array<i64: 1, 8>}, {transform_indices = @transform_2, window_bounds = array<i64: 8, 1>}, {transform_indices = @transform_3, window_bounds = array<i64: 8, 32>}, {transform_indices = @transform_4, window_bounds = array<i64: 8, 32>}, {transform_indices = @transform_5, window_bounds = array<i64: 8, 1>}]} {
    %c0_i32 = arith.constant 0 : i32
    %0 = arith.cmpi eq, %arg1, %c0_i32 : i32
    %1 = arith.extui %0 : i1 to i32
    %c0_i32_0 = arith.constant 0 : i32
    %2 = arith.cmpi ne, %1, %c0_i32_0 : i32
    scf.if %2 {
      %cst_31 = arith.constant -1.000000e+30 : f32
      %56 = vector.broadcast %cst_31 : f32 to vector<8x1xf32>
      %c0_32 = arith.constant 0 : index
      %c0_33 = arith.constant 0 : index
      %57 = vector.load %arg8[%c0_32, %c0_33] : memref<8x1xf32, #tpu.memory_space<vmem>>, vector<8x1xf32>
      tpu.vector_store %arg8[%c0_32, %c0_33], %56 {strides = array<i32>} : memref<8x1xf32, #tpu.memory_space<vmem>>, vector<8x1xf32>,
      %cst_34 = arith.constant 0.000000e+00 : f32
      %58 = vector.broadcast %cst_34 : f32 to vector<8x1xf32>
      %c0_35 = arith.constant 0 : index
      %c0_36 = arith.constant 0 : index
      %59 = vector.load %arg9[%c0_35, %c0_36] : memref<8x1xf32, #tpu.memory_space<vmem>>, vector<8x1xf32>
      tpu.vector_store %arg9[%c0_35, %c0_36], %58 {strides = array<i32>} : memref<8x1xf32, #tpu.memory_space<vmem>>, vector<8x1xf32>,
      %cst_37 = arith.constant 0.000000e+00 : f32
      %60 = vector.broadcast %cst_37 : f32 to vector<8x1xf32>
      %c0_38 = arith.constant 0 : index
      %c0_39 = arith.constant 0 : index
      %61 = vector.load %arg10[%c0_38, %c0_39] : memref<8x1xf32, #tpu.memory_space<vmem>>, vector<8x1xf32>
      tpu.vector_store %arg10[%c0_38, %c0_39], %60 {strides = array<i32>} : memref<8x1xf32, #tpu.memory_space<vmem>>, vector<8x1xf32>,
    } else {
    }
    %c0 = arith.constant 0 : index
    %c0_1 = arith.constant 0 : index
    %3 = vector.load %arg5[%c0, %c0_1] : memref<8x32xbf16, #tpu.memory_space<vmem>>, vector<8x32xbf16>
    %cst = arith.constant 1.431250e+01 : bf16
    %4 = vector.broadcast %cst : bf16 to vector<8x32xbf16>
    %5 = arith.mulf %3, %4 : vector<8x32xbf16>
    %c0_2 = arith.constant 0 : index
    %c0_3 = arith.constant 0 : index
    %6 = vector.load %arg6[%c0_2, %c0_3] : memref<8x32xbf16, #tpu.memory_space<vmem>>, vector<8x32xbf16>
    %cst_4 = arith.constant dense<0.000000e+00> : vector<8x8xf32>
    %7 = tpu.matmul %5, %6, %cst_4 {dimension_numbers = #tpu.dot_dimension_numbers<[1], [1], [0], [0], [0, 0, 1, 0], [], []>} : vector<8x32xbf16>, vector<8x32xbf16>, vector<8x8xf32> -> vector<8x8xf32>
    %8 = tpu.iota {dimensions = array<i32: 0>} : vector<8x8xi32>
    %c8_i32 = arith.constant 8 : i32
    %9 = arith.muli %arg0, %c8_i32 : i32
    %10 = vector.broadcast %9 : i32 to vector<8x8xi32>
    %11 = arith.addi %8, %10 : vector<8x8xi32>
    %12 = tpu.iota {dimensions = array<i32: 1>} : vector<8x8xi32>
    %c8_i32_5 = arith.constant 8 : i32
    %13 = arith.muli %arg1, %c8_i32_5 : i32
    %14 = vector.broadcast %13 : i32 to vector<8x8xi32>
    %15 = arith.addi %12, %14 : vector<8x8xi32>
    %c8_i32_6 = arith.constant 8 : i32
    %16 = vector.broadcast %c8_i32_6 : i32 to vector<8x8xi32>
    %17 = arith.cmpi slt, %15, %16 : vector<8x8xi32>
    %18 = arith.cmpi ne, %11, %15 : vector<8x8xi32>
    %19 = arith.andi %17, %18 : vector<8x8xi1>
    %c0_7 = arith.constant 0 : index
    %c0_8 = arith.constant 0 : index
    %20 = vector.load %arg2[%c0_7, %c0_8] : memref<8x1xi32, #tpu.memory_space<vmem>>, vector<8x1xi32>
    %c0_9 = arith.constant 0 : index
    %c0_10 = arith.constant 0 : index
    %21 = vector.load %arg3[%c0_9, %c0_10] : memref<1x8xi32, #tpu.memory_space<vmem>>, vector<1x8xi32>
    %22 = vector.broadcast %20 : vector<8x1xi32> to vector<8x8xi32>
    %23 = vector.broadcast %21 : vector<1x8xi32> to vector<8x8xi32>
    %24 = arith.cmpi eq, %22, %23 : vector<8x8xi32>
    %25 = arith.andi %19, %24 : vector<8x8xi1>
    %cst_11 = arith.constant 0.000000e+00 : f32
    %26 = vector.broadcast %cst_11 : f32 to vector<8x8xf32>
    %27 = arith.select %25, %7, %26 : vector<8x8xi1>, vector<8x8xf32>
    %cst_12 = arith.constant -1.000000e+30 : f32
    %28 = vector.broadcast %cst_12 : f32 to vector<8x8xf32>
    %29 = arith.select %17, %7, %28 : vector<8x8xi1>, vector<8x8xf32>
    %cst_13 = arith.constant dense<0xFF800000> : vector<8xf32>
    %30 = vector.multi_reduction <maximumf>, %29, %cst_13 [1] : vector<8x8xf32> to vector<8xf32>
    %31 = vector.shape_cast %30 : vector<8xf32> to vector<8x1xf32>
    %c0_14 = arith.constant 0 : index
    %c0_15 = arith.constant 0 : index
    %32 = vector.load %arg8[%c0_14, %c0_15] : memref<8x1xf32, #tpu.memory_space<vmem>>, vector<8x1xf32>
    %33 = arith.maximumf %32, %31 : vector<8x1xf32>
    %34 = arith.subf %32, %33 : vector<8x1xf32>
    %35 = math.exp %34 : vector<8x1xf32>
    %36 = vector.broadcast %33 : vector<8x1xf32> to vector<8x8xf32>
    %37 = arith.subf %7, %36 : vector<8x8xf32>
    %38 = math.exp %37 : vector<8x8xf32>
    %cst_16 = arith.constant 0.000000e+00 : f32
    %39 = vector.broadcast %cst_16 : f32 to vector<8x8xf32>
    %40 = arith.select %19, %38, %39 : vector<8x8xi1>, vector<8x8xf32>
    %c0_17 = arith.constant 0 : index
    %c0_18 = arith.constant 0 : index
    %41 = vector.load %arg9[%c0_17, %c0_18] : memref<8x1xf32, #tpu.memory_space<vmem>>, vector<8x1xf32>
    %42 = arith.mulf %35, %41 : vector<8x1xf32>
    %cst_19 = arith.constant dense<0.000000e+00> : vector<8xf32>
    %43 = vector.multi_reduction <add>, %40, %cst_19 [1] : vector<8x8xf32> to vector<8xf32>
    %44 = vector.shape_cast %43 : vector<8xf32> to vector<8x1xf32>
    %45 = arith.addf %42, %44 : vector<8x1xf32>
    %c0_20 = arith.constant 0 : index
    %c0_21 = arith.constant 0 : index
    %46 = vector.load %arg9[%c0_20, %c0_21] : memref<8x1xf32, #tpu.memory_space<vmem>>, vector<8x1xf32>
    tpu.vector_store %arg9[%c0_20, %c0_21], %45 {strides = array<i32>} : memref<8x1xf32, #tpu.memory_space<vmem>>, vector<8x1xf32>,
    %c0_22 = arith.constant 0 : index
    %c0_23 = arith.constant 0 : index
    %47 = vector.load %arg10[%c0_22, %c0_23] : memref<8x1xf32, #tpu.memory_space<vmem>>, vector<8x1xf32>
    %cst_24 = arith.constant dense<0.000000e+00> : vector<8xf32>
    %48 = vector.multi_reduction <add>, %27, %cst_24 [1] : vector<8x8xf32> to vector<8xf32>
    %49 = vector.shape_cast %48 : vector<8xf32> to vector<8x1xf32>
    %50 = arith.addf %47, %49 : vector<8x1xf32>
    %c0_25 = arith.constant 0 : index
    %c0_26 = arith.constant 0 : index
    %51 = vector.load %arg10[%c0_25, %c0_26] : memref<8x1xf32, #tpu.memory_space<vmem>>, vector<8x1xf32>
    tpu.vector_store %arg10[%c0_25, %c0_26], %50 {strides = array<i32>} : memref<8x1xf32, #tpu.memory_space<vmem>>, vector<8x1xf32>,
    %c0_27 = arith.constant 0 : index
    %c0_28 = arith.constant 0 : index
    %52 = vector.load %arg8[%c0_27, %c0_28] : memref<8x1xf32, #tpu.memory_space<vmem>>, vector<8x1xf32>
    tpu.vector_store %arg8[%c0_27, %c0_28], %33 {strides = array<i32>} : memref<8x1xf32, #tpu.memory_space<vmem>>, vector<8x1xf32>,
    %c0_i32_29 = arith.constant 0 : i32
    %53 = arith.cmpi eq, %arg1, %c0_i32_29 : i32
    %54 = arith.extui %53 : i1 to i32
    %c0_i32_30 = arith.constant 0 : i32
    %55 = arith.cmpi ne, %54, %c0_i32_30 : i32
    scf.if %55 {
      %c0_31 = arith.constant 0 : index
      %c0_32 = arith.constant 0 : index
      %56 = vector.load %arg4[%c0_31, %c0_32] : memref<8x1xf32, #tpu.memory_space<vmem>>, vector<8x1xf32>
      %c0_33 = arith.constant 0 : index
      %c0_34 = arith.constant 0 : index
      %57 = vector.load %arg8[%c0_33, %c0_34] : memref<8x1xf32, #tpu.memory_space<vmem>>, vector<8x1xf32>
      %c0_35 = arith.constant 0 : index
      %c0_36 = arith.constant 0 : index
      %58 = vector.load %arg9[%c0_35, %c0_36] : memref<8x1xf32, #tpu.memory_space<vmem>>, vector<8x1xf32>
      %cst_37 = arith.constant 9.99999997E-7 : f32
      %59 = vector.broadcast %cst_37 : f32 to vector<8x1xf32>
      %60 = arith.addf %58, %59 : vector<8x1xf32>
      %61 = math.log %60 : vector<8x1xf32>
      %62 = arith.addf %57, %61 : vector<8x1xf32>
      %c0_38 = arith.constant 0 : index
      %c0_39 = arith.constant 0 : index
      %63 = vector.load %arg10[%c0_38, %c0_39] : memref<8x1xf32, #tpu.memory_space<vmem>>, vector<8x1xf32>
      %64 = arith.mulf %63, %56 : vector<8x1xf32>
      %cst_40 = arith.constant 0.000000e+00 : f32
      %65 = vector.broadcast %cst_40 : f32 to vector<8x1xf32>
      %66 = arith.cmpf one, %56, %65 : vector<8x1xf32>
      %cst_41 = arith.constant 0.000000e+00 : f32
      %67 = vector.broadcast %cst_41 : f32 to vector<8x1xf32>
      %68 = arith.select %66, %62, %67 : vector<8x1xi1>, vector<8x1xf32>
      %69 = arith.subf %64, %68 : vector<8x1xf32>
      %cst_42 = arith.constant -1.000000e+00 : f32
      %70 = vector.broadcast %cst_42 : f32 to vector<8x1xf32>
      %71 = arith.mulf %70, %69 : vector<8x1xf32>
      %c0_43 = arith.constant 0 : index
      %c0_44 = arith.constant 0 : index
      %72 = vector.load %arg7[%c0_43, %c0_44] : memref<8x1xf32, #tpu.memory_space<vmem>>, vector<8x1xf32>
      tpu.vector_store %arg7[%c0_43, %c0_44], %71 {strides = array<i32>} : memref<8x1xf32, #tpu.memory_space<vmem>>, vector<8x1xf32>,
    } else {
    }
    return
  }
  func.func @transform_0(%arg0: i32, %arg1: i32) -> (i32, i32) {
    %c0_i32 = arith.constant 0 : i32
    %c0_i32_0 = arith.constant 0 : i32
    return %arg0, %c0_i32 : i32, i32
  }
  func.func @transform_1(%arg0: i32, %arg1: i32) -> (i32, i32) {
    %c0_i32 = arith.constant 0 : i32
    %c0_i32_0 = arith.constant 0 : i32
    return %c0_i32, %arg1 : i32, i32
  }
  func.func @transform_2(%arg0: i32, %arg1: i32) -> (i32, i32) {
    %c0_i32 = arith.constant 0 : i32
    %c0_i32_0 = arith.constant 0 : i32
    return %arg0, %c0_i32 : i32, i32
  }
  func.func @transform_3(%arg0: i32, %arg1: i32) -> (i32, i32) {
    %c0_i32 = arith.constant 0 : i32
    %c0_i32_0 = arith.constant 0 : i32
    return %arg0, %c0_i32 : i32, i32
  }
  func.func @transform_4(%arg0: i32, %arg1: i32) -> (i32, i32) {
    %c0_i32 = arith.constant 0 : i32
    %c0_i32_0 = arith.constant 0 : i32
    return %arg1, %c0_i32 : i32, i32
  }
  func.func @transform_5(%arg0: i32, %arg1: i32) -> (i32, i32) {
    %c0_i32 = arith.constant 0 : i32
    %c0_i32_0 = arith.constant 0 : i32
    return %arg0, %c0_i32 : i32, i32
  }
}

</mosaic_0001>

<bundles_post_ra>
// kernel: tpu_custom_call.1
= control target key start
LH: loop header
LB: loop body
LE: loop exit
PB: predicated region body
PF: predicated region fallthrough
CT: control target
= control target key end

     0   :  { %vm26_vm0 = vcmask 7168   ;;  %vm33_vm1 = vcmask 261120   ;;  %v182_v0 = vmov 0.0   ;;  %vm183_vm2 = vmmov 0   ;;  %s249_s4 = inlined_call_operand.vmem [shape: bf16[8,32], index: 4, kind: input, shape index: {}]   ;;  %s250_s3 = inlined_call_operand.vmem [shape: bf16[8,32], index: 3, kind: input, shape index: {}]   ;;  %s251_s0 = inlined_call_operand.vmem [shape: s32[8,1], index: 0, kind: input, shape index: {}]   ;;  %s252_s1 = inlined_call_operand.vmem [shape: s32[1,8], index: 1, kind: input, shape index: {}]   ;;  %s253_s2 = inlined_call_operand.vmem [shape: f32[8,1], index: 2, kind: input, shape index: {}]   ;;  %s254_s5 = inlined_call_operand.vmem [shape: f32[8,1], index: 5, kind: output, shape index: {}]  }
   0x1   :  { %28 = vst.msk [vmem:[#allocation3] sm:$0xff] %vm26_vm0, %v182_v0  ;;  %29 = vst.msk [vmem:[#allocation4] sm:$0xff] %vm26_vm0, %v182_v0  ;;  %164 = vmatprep.subr.bf16.mxu0 %v182_v0  ;;  %v32_v1 = vld [vmem:[%s249_s4] sm:$0xf]  ;;  %166 = vmatprep.mubr.msk.bf16.mxu0 %vm183_vm2, %v182_v0  ;;  %v80_v3 = vlaneseq  ;;  %v184_v5 = vmov 0   ;;  %vm106_vm4 = vcmask 64512  }
   0x2   :  { %v93_v2 = vld [vmem:[%s251_s0] sm:$0xff]  ;;  %v38_v4 = vsel %vm33_vm1, %v32_v1, 0  ;;  %175 = vset.pattern.permute.xlu1 %v184_v5  ;;  %174 = vset.pattern.permute.xlu0 %v184_v5  ;;  %v185_v10 = vmov -1e+30  }
   0x3   :  { %165 = vmatpush3.bf16.xpose.msra.mxu0 %v38_v4  ;;  %v30_v6 = vld [vmem:[%s250_s3] sm:$0xf]  ;;  %96 = vperm.xlu1 %175, %v93_v2   ;;  %v81_v7 = vshrl.u32 %v80_v3, 7  ;;  %v86_v8 = vand.u32 127, %v80_v3  ;;  %27 = vst.msk [vmem:[#allocation2] sm:$0xff] %vm26_vm0, %v185_v10 }
   0x4   :  { %v31_v9 = vmul.bf16 1097154917, %v30_v6  ;;  %v161_v24 = vld [vmem:[%s252_s1] ss:$0 sm:$0xff] }
   0x5   :  { %vm91_vm3 = vcmp.ne.s32.totalorder %v81_v7, %v86_v8  ;;  %vm90_vm5 = vcmp.lt.s32.totalorder %v86_v8, 8  ;;  %v142_v44 = vld [vmem:[%s253_s2] sm:$0xff] }
   0x6   :  { %vm92_vm6 = vmand %vm90_vm5, %vm91_vm3  ;;  %vm151_vm9 = vcmp.ne.f32.partialorder %v142_v44, 0.0 }
   0x8   :  { %v124_v33 = vld [vmem:[#allocation3] sm:$0xff]  ;;  %v132_v37 = vld [vmem:[#allocation4] sm:$0xff] }
   0xa   :  { %167 = vmatmul.mubr.msk.bf16.vlgmr.msra.gmra.mxu0 %vm33_vm1, %v31_v9  ;;  %v110_v17 = vld [vmem:[#allocation2] sm:$0xff] }
  0x7e   :  { %v97_v25 = vpop.permute.xlu1 %96 }
  0x7f   :  { %vm102_vm7 = vcmp.eq.s32.totalorder %v97_v25, %v161_v24 }
  0x80   :  { %vm103_vm8 = vmand %vm92_vm6, %vm102_vm7 }
  0xca   :  { %v74_v11 = vpop.f32.mrf.mxu0 }
  0xcb   :  { %v105_v12 = vsel %vm90_vm5, %v74_v11, -1e+30  ;;  %v104_v29 = vsel %vm103_vm8, %v74_v11, 0.0 }
  0xcc   :  { %v168_v13 = vpop.f32.mrf.mxu0  ;;  %v107_v14 = vsel %vm106_vm4, %v105_v12, -inf  ;;  %v133_v30 = vsel %vm106_vm4, %v104_v29, 0.0 }
  0xcd   :  { %108 = vmax.xlane.f32.xlu0 %v107_v14 }
  0xce   :  { %v77_v15 = vpop.f32.mrf.mxu0 }
  0xd0   :  { %v169_v16 = vpop.f32.mrf.mxu0 }
 0x156   :  { %v109_v18 = vpop.xlane.xlu0 %108 }
 0x157   :  { %v111_v19 = vmax.f32 %v110_v17, %v109_v18 }
 0x159   :  { %v112_v20 = vsub.f32 %v110_v17, %v111_v19  ;;  %138 = vst.msk [vmem:[#allocation2] sm:$0xff] %vm26_vm0, %v111_v19  ;;  %117 = vperm.xlu0 %174, %v111_v19  }
 0x15b   :  { %v113_v31 = vmul.f32 1.442695, %v112_v20 }
 0x160   :  { %v143_v46 = vld [vmem:[#allocation2] sm:$0xff] }
 0x1d4   :  { %v118_v21 = vpop.permute.xlu0 %117 }
 0x1d5   :  { %v120_v22 = vsub.f32 %v74_v11, %v118_v21 }
 0x1d7   :  { %v121_v23 = vmul.f32 1.442695, %v120_v22 }
 0x1d9   :  { %176 = vpow2.f32 %v121_v23 }
 0x1da   :  { %178 = vpow2.f32 %v113_v31 }
 0x1e6   :  { %v177_v26 = vpop.eup %176 }
 0x1e7   :  { %v123_v27 = vsel %vm92_vm6, %v177_v26, 0.0  ;;  %v179_v32 = vpop.eup %178 }
 0x1e8   :  { %v126_v28 = vsel %vm106_vm4, %v123_v27, 0.0  ;;  %v125_v34 = vmul.f32 %v179_v32, %v124_v33 }
 0x1e9   :  { %127 = vadd.xlane.f32.xlu1 %v126_v28 }
 0x1ed   :  { %134 = vadd.xlane.f32.xlu1 %v133_v30 }
 0x272   :  { %v128_v35 = vpop.xlane.xlu1 %127 }
 0x273   :  { %v129_v36 = vadd.f32 %v128_v35, %v125_v34 }
 0x275   :  { %131 = vst.msk [vmem:[#allocation3] sm:$0xff] %vm26_vm0, %v129_v36 }
 0x276   :  { %v135_v38 = vpop.xlane.xlu1 %134 }
 0x277   :  { %v136_v39 = vadd.f32 %v135_v38, %v132_v37 }
 0x279   :  { %137 = vst.msk [vmem:[#allocation4] sm:$0xff] %vm26_vm0, %v136_v39 }
 0x27c   :  { %v144_v40 = vld [vmem:[#allocation3] sm:$0xff] }
 0x27d   :  { %v145_v41 = vadd.f32 1e-06, %v144_v40 }
 0x27f   :  { %180 = vlog2.f32 %v145_v41 }
 0x280   :  { %v149_v45 = vld [vmem:[#allocation4] sm:$0xff] }
 0x281   :  { %v150_v48 = vmul.f32 %v149_v45, %v142_v44 }
 0x28c   :  { %v181_v42 = vpop.eup %180 }
 0x28d   :  { %v147_v43 = vmul.f32 0.6931472, %v181_v42 }
 0x28f   :  { %v148_v47 = vadd.f32 %v147_v43, %v143_v46 }
 0x291   :  { %v152_v49 = vsel %vm151_vm9, %v148_v47, 0.0 }
 0x292   :  { %v153_v50 = vsub.f32 %v150_v48, %v152_v49 }
 0x294   :  { %v154_v51 = vmul.f32 -1.0, %v153_v50 }
 0x296   :  { %155 = vst.msk [vmem:[%s254_s5] sm:$0xff] %vm26_vm0, %v154_v51 }

</bundles_post_ra>
